<compile_context>
chip_gen: v7x
topology: tpu7x:2x2x1
jax: 0.10.0
libtpu: 0.0.40
codegen_flags: <defaults>
</compile_context>

<pallas_src>
import numpy as np
import jax
import jax.numpy as jnp
from jax.experimental import pallas as pl
from jax.experimental.pallas import tpu as pltpu


def _front_end(k):
    end = (k - 1) // 2
    front = k - 1 - end
    return front, end


def _avg_matrix(k, L):
    """(L, L) matrix A such that (A @ x)[i] == replicate-padded moving average, window k."""
    front, end = _front_end(k)
    a = np.zeros((L, L), dtype=np.float32)
    inv_k = 1.0 / float(k)
    for i in range(L):
        for p in range(i - front, i + end + 1):
            j = min(max(p, 0), L - 1)
            a[i, j] += inv_k
    return a


def _make_kernel(n_k, b_blk, batch_div, out_dtype):
    """Kernel over (a_ref, x_ref, sea_ref, *ma_refs) with blocks:
         a_ref   : (n_k, L, L) f32 averaging matrices (constant across the grid)
         x_ref   : (b_blk, L, C_blk) input tile, channels on lanes
         sea_ref : (b_blk, L, C_blk) residual = sum_i (x - ma_i) / batch_div
         ma_refs : one (b_blk, L, C_blk) tile per kernel size
    """
    c0 = float(n_k) / float(batch_div)
    inv_b = 1.0 / float(batch_div)

    def kernel(a_ref, x_ref, sea_ref, *ma_refs):
        for bi in range(b_blk):
            x32 = x_ref[bi].astype(jnp.float32)                       # (L, C_blk)
            ma_sum = jnp.zeros_like(x32)
            for i in range(n_k):
                ma = jnp.dot(a_ref[i], x32, preferred_element_type=jnp.float32)
                ma_refs[i][bi] = ma.astype(out_dtype)
                ma_sum = ma_sum + ma
            # sum_i (x - ma_i) / batch_div  ==  (n_k/B)*x - (1/B)*sum_i ma_i
            sea_ref[bi] = (c0 * x32 - inv_b * ma_sum).astype(out_dtype)

    return kernel


def _vmem_capacity_bytes():
    try:
        info = pltpu.get_tpu_info()
        cap = getattr(info, "vmem_capacity_bytes", None)
        if cap:
            return int(cap)
    except Exception:
        pass
    return 64 * 1024 * 1024  # conservative v7x-sized default


def _tile_vmem_bytes(b_blk, L, c_blk, n_k, itemsize):
    io = 2 * (2 + n_k) * b_blk * L * c_blk * itemsize   # in + (1+n_k) outs, double-buffered
    mats = 2 * n_k * L * L * 4                          # averaging matrices
    temps = 4 * b_blk * L * c_blk * 4                   # f32 temporaries
    return io + mats + temps


def _pick_c_block(C, L, n_k, itemsize, budget):
    if C <= 128 or C % 128 != 0:
        return C                      # block == full last dim is always legal
    for c in range(C, 127, -128):     # largest multiple-of-128 divisor that fits budget
        if C % c == 0 and _tile_vmem_bytes(1, L, c, n_k, itemsize) <= budget:
            return c
    return 128


def _pick_b_block(B, c_tiles, L, c_blk, n_k, itemsize, budget):
    """Largest divisor of B that fits the VMEM budget, keeps >= 2 grid steps when the
    problem allows it, and stops growing once each step moves a few MiB of I/O."""
    target_io = 4 * 1024 * 1024
    per_b_io = (2 + n_k) * L * c_blk * itemsize
    best = 1
    for d in sorted(x for x in range(1, min(B, 32) + 1) if B % x == 0):
        if _tile_vmem_bytes(d, L, c_blk, n_k, itemsize) > budget:
            break
        if (B // d) * c_tiles < 2 and B * c_tiles >= 2:
            break                     # keep >= 2 grid steps (v7x dual-TensorCore sharding)
        best = d
        if d * per_b_io >= target_io:
            break
    return best


def series_decomp_avgmulti(x, kernel_sizes):
    """Returns (sea, moving_mean_list) matching series_decomp_AVGmulti.forward."""
    B, L, C = x.shape
    dtype = x.dtype
    itemsize = jnp.dtype(dtype).itemsize
    ks = tuple(int(k) for k in kernel_sizes)
    n_k = len(ks)

    # Banded averaging matrices with the replicate padding folded into the edge columns.
    # TODO(synk): add an L-tiled (halo) path for very long sequences where the (L, L)
    # averaging matrices would dominate VMEM.
    a_mats = jnp.asarray(np.stack([_avg_matrix(k, L) for k in ks], axis=0))  # (n_k, L, L) f32

    vmem_cap = _vmem_capacity_bytes()
    vmem_limit = min(int(vmem_cap * 0.75), 100 * 1024 * 1024)   # ~96 MiB on v5e/v6e, ~48 MiB on v7x
    budget = int(vmem_limit * 0.75)

    c_blk = _pick_c_block(C, L, n_k, itemsize, budget)
    c_tiles = C // c_blk
    b_blk = _pick_b_block(B, c_tiles, L, c_blk, n_k, itemsize, budget)
    grid = (B // b_blk, c_tiles)

    kernel = _make_kernel(n_k, b_blk, B, dtype)
    xblk = pl.BlockSpec((b_blk, L, c_blk), lambda b, c: (b, 0, c))
    ablk = pl.BlockSpec((n_k, L, L), lambda b, c: (0, 0, 0))
    n_out = 1 + n_k

    bytes_accessed = (2 + n_k) * B * L * C * itemsize + n_k * L * L * 4
    flops = 2 * n_k * B * L * L * C + 3 * B * L * C

    outs = pl.pallas_call(
        kernel,
        out_shape=tuple(jax.ShapeDtypeStruct((B, L, C), dtype) for _ in range(n_out)),
        grid=grid,
        in_specs=[ablk, xblk],
        out_specs=tuple(xblk for _ in range(n_out)),
        compiler_params=pltpu.CompilerParams(
            dimension_semantics=("parallel", "parallel"),
            vmem_limit_bytes=vmem_limit,
        ),
        cost_estimate=pl.CostEstimate(
            flops=int(flops), transcendentals=0, bytes_accessed=int(bytes_accessed)),
    )(a_mats, x)

    sea = outs[0]
    moving_mean = list(outs[1:])
    return sea, moving_mean


def _reference(x, kernel_sizes):
    """Pure-JAX reference mirroring the PyTorch module."""
    B, L, C = x.shape
    moving_mean = []
    res = []
    for k in kernel_sizes:
        front, end = _front_end(k)
        xp = jnp.concatenate(
            [jnp.repeat(x[:, 0:1, :], front, axis=1), x,
             jnp.repeat(x[:, -1:, :], end, axis=1)],
            axis=1,
        )
        ma = jnp.stack([xp[:, i:i + L, :] for i in range(k)], axis=0).mean(axis=0)
        moving_mean.append(ma)
        res.append(x - ma)
    sea = sum(res) / B          # PyTorch quirk: len(sea) == batch size B
    return sea, moving_mean


if __name__ == "__main__":
    B, L, C = 2, 8, 32
    kernel_sizes = [3, 5, 4]    # odd + even windows -> asymmetric replicate padding

    key = jax.random.PRNGKey(0)
    x = jax.random.normal(key, (B, L, C), dtype=jnp.float32)

    sea, moving_mean = series_decomp_avgmulti(x, kernel_sizes)
    sea = jax.block_until_ready(sea)
    moving_mean = [jax.block_until_ready(m) for m in moving_mean]

    sea_ref, mm_ref = _reference(x, kernel_sizes)
    assert jnp.allclose(sea, sea_ref, atol=1e-5, rtol=1e-5)
    for a, b in zip(moving_mean, mm_ref):
        assert jnp.allclose(a, b, atol=1e-5, rtol=1e-5)

    print("KERNEL_OK")
</pallas_src>

<mosaic_0001>
module attributes {stable_mosaic.version = 11 : i64} {
  func.func @kernel(%arg0: i32, %arg1: i32, %arg2: memref<3x8x8xf32, #tpu.memory_space<vmem>>, %arg3: memref<1x8x32xf32, #tpu.memory_space<vmem>>, %arg4: memref<1x8x32xf32, #tpu.memory_space<vmem>>, %arg5: memref<1x8x32xf32, #tpu.memory_space<vmem>>, %arg6: memref<1x8x32xf32, #tpu.memory_space<vmem>>, %arg7: memref<1x8x32xf32, #tpu.memory_space<vmem>>) attributes {dimension_semantics = [#tpu.dimension_semantics<parallel>, #tpu.dimension_semantics<parallel>], iteration_bounds = array<i64: 2, 1>, scalar_prefetch = 0 : i64, scratch_operands = 0 : i64, tpu.core_type = #tpu.core_type<tc>, window_params = [{pipeline_mode = #tpu.pipeline_mode<synchronous>, transform_indices = @transform_0, window_bounds = array<i64: 3, 8, 8>}, {transform_indices = @transform_1, window_bounds = array<i64: 1, 8, 32>}, {transform_indices = @transform_2, window_bounds = array<i64: 1, 8, 32>}, {transform_indices = @transform_3, window_bounds = array<i64: 1, 8, 32>}, {transform_indices = @transform_4, window_bounds = array<i64: 1, 8, 32>}, {transform_indices = @transform_5, window_bounds = array<i64: 1, 8, 32>}]} {
    %c0 = arith.constant 0 : index
    %c0_0 = arith.constant 0 : index
    %c0_1 = arith.constant 0 : index
    %0 = vector.load %arg3[%c0, %c0_0, %c0_1] : memref<1x8x32xf32, #tpu.memory_space<vmem>>, vector<1x8x32xf32>
    %1 = vector.shape_cast %0 : vector<1x8x32xf32> to vector<8x32xf32>
    %cst = arith.constant 0.000000e+00 : f32
    %2 = vector.broadcast %cst : f32 to vector<8x32xf32>
    %c0_2 = arith.constant 0 : index
    %c0_3 = arith.constant 0 : index
    %c0_4 = arith.constant 0 : index
    %3 = vector.load %arg2[%c0_2, %c0_3, %c0_4] : memref<3x8x8xf32, #tpu.memory_space<vmem>>, vector<1x8x8xf32>
    %4 = vector.shape_cast %3 : vector<1x8x8xf32> to vector<8x8xf32>
    %cst_5 = arith.constant dense<0.000000e+00> : vector<8x32xf32>
    %5 = tpu.matmul %4, %1, %cst_5 {dimension_numbers = #tpu.dot_dimension_numbers<[1], [0], [0], [1], [0, 0, 1, 1], [], []>} : vector<8x8xf32>, vector<8x32xf32>, vector<8x32xf32> -> vector<8x32xf32>
    %c0_6 = arith.constant 0 : index
    %c0_7 = arith.constant 0 : index
    %c0_8 = arith.constant 0 : index
    %6 = vector.load %arg5[%c0_6, %c0_7, %c0_8] : memref<1x8x32xf32, #tpu.memory_space<vmem>>, vector<1x8x32xf32>
    %7 = vector.shape_cast %6 : vector<1x8x32xf32> to vector<8x32xf32>
    %8 = vector.shape_cast %5 : vector<8x32xf32> to vector<1x8x32xf32>
    tpu.vector_store %arg5[%c0_6, %c0_7, %c0_8], %8 {strides = array<i32>} : memref<1x8x32xf32, #tpu.memory_space<vmem>>, vector<1x8x32xf32>,
    %9 = arith.addf %2, %5 : vector<8x32xf32>
    %c1 = arith.constant 1 : index
    %c0_9 = arith.constant 0 : index
    %c0_10 = arith.constant 0 : index
    %10 = vector.load %arg2[%c1, %c0_9, %c0_10] : memref<3x8x8xf32, #tpu.memory_space<vmem>>, vector<1x8x8xf32>
    %11 = vector.shape_cast %10 : vector<1x8x8xf32> to vector<8x8xf32>
    %cst_11 = arith.constant dense<0.000000e+00> : vector<8x32xf32>
    %12 = tpu.matmul %11, %1, %cst_11 {dimension_numbers = #tpu.dot_dimension_numbers<[1], [0], [0], [1], [0, 0, 1, 1], [], []>} : vector<8x8xf32>, vector<8x32xf32>, vector<8x32xf32> -> vector<8x32xf32>
    %c0_12 = arith.constant 0 : index
    %c0_13 = arith.constant 0 : index
    %c0_14 = arith.constant 0 : index
    %13 = vector.load %arg6[%c0_12, %c0_13, %c0_14] : memref<1x8x32xf32, #tpu.memory_space<vmem>>, vector<1x8x32xf32>
    %14 = vector.shape_cast %13 : vector<1x8x32xf32> to vector<8x32xf32>
    %15 = vector.shape_cast %12 : vector<8x32xf32> to vector<1x8x32xf32>
    tpu.vector_store %arg6[%c0_12, %c0_13, %c0_14], %15 {strides = array<i32>} : memref<1x8x32xf32, #tpu.memory_space<vmem>>, vector<1x8x32xf32>,
    %16 = arith.addf %9, %12 : vector<8x32xf32>
    %c2 = arith.constant 2 : index
    %c0_15 = arith.constant 0 : index
    %c0_16 = arith.constant 0 : index
    %17 = vector.load %arg2[%c2, %c0_15, %c0_16] : memref<3x8x8xf32, #tpu.memory_space<vmem>>, vector<1x8x8xf32>
    %18 = vector.shape_cast %17 : vector<1x8x8xf32> to vector<8x8xf32>
    %cst_17 = arith.constant dense<0.000000e+00> : vector<8x32xf32>
    %19 = tpu.matmul %18, %1, %cst_17 {dimension_numbers = #tpu.dot_dimension_numbers<[1], [0], [0], [1], [0, 0, 1, 1], [], []>} : vector<8x8xf32>, vector<8x32xf32>, vector<8x32xf32> -> vector<8x32xf32>
    %c0_18 = arith.constant 0 : index
    %c0_19 = arith.constant 0 : index
    %c0_20 = arith.constant 0 : index
    %20 = vector.load %arg7[%c0_18, %c0_19, %c0_20] : memref<1x8x32xf32, #tpu.memory_space<vmem>>, vector<1x8x32xf32>
    %21 = vector.shape_cast %20 : vector<1x8x32xf32> to vector<8x32xf32>
    %22 = vector.shape_cast %19 : vector<8x32xf32> to vector<1x8x32xf32>
    tpu.vector_store %arg7[%c0_18, %c0_19, %c0_20], %22 {strides = array<i32>} : memref<1x8x32xf32, #tpu.memory_space<vmem>>, vector<1x8x32xf32>,
    %23 = arith.addf %16, %19 : vector<8x32xf32>
    %cst_21 = arith.constant 1.500000e+00 : f32
    %24 = vector.broadcast %cst_21 : f32 to vector<8x32xf32>
    %25 = arith.mulf %24, %1 : vector<8x32xf32>
    %cst_22 = arith.constant 5.000000e-01 : f32
    %26 = vector.broadcast %cst_22 : f32 to vector<8x32xf32>
    %27 = arith.mulf %26, %23 : vector<8x32xf32>
    %28 = arith.subf %25, %27 : vector<8x32xf32>
    %c0_23 = arith.constant 0 : index
    %c0_24 = arith.constant 0 : index
    %c0_25 = arith.constant 0 : index
    %29 = vector.load %arg4[%c0_23, %c0_24, %c0_25] : memref<1x8x32xf32, #tpu.memory_space<vmem>>, vector<1x8x32xf32>
    %30 = vector.shape_cast %29 : vector<1x8x32xf32> to vector<8x32xf32>
    %31 = vector.shape_cast %28 : vector<8x32xf32> to vector<1x8x32xf32>
    tpu.vector_store %arg4[%c0_23, %c0_24, %c0_25], %31 {strides = array<i32>} : memref<1x8x32xf32, #tpu.memory_space<vmem>>, vector<1x8x32xf32>,
    return
  }
  func.func @transform_0(%arg0: i32, %arg1: i32) -> (i32, i32, i32) {
    %c0_i32 = arith.constant 0 : i32
    %c0_i32_0 = arith.constant 0 : i32
    %c0_i32_1 = arith.constant 0 : i32
    %c0_i32_2 = arith.constant 0 : i32
    return %c0_i32, %c0_i32_0, %c0_i32_1 : i32, i32, i32
  }
  func.func @transform_1(%arg0: i32, %arg1: i32) -> (i32, i32, i32) {
    %c0_i32 = arith.constant 0 : i32
    %c0_i32_0 = arith.constant 0 : i32
    return %arg0, %c0_i32, %arg1 : i32, i32, i32
  }
  func.func @transform_2(%arg0: i32, %arg1: i32) -> (i32, i32, i32) {
    %c0_i32 = arith.constant 0 : i32
    %c0_i32_0 = arith.constant 0 : i32
    return %arg0, %c0_i32, %arg1 : i32, i32, i32
  }
  func.func @transform_3(%arg0: i32, %arg1: i32) -> (i32, i32, i32) {
    %c0_i32 = arith.constant 0 : i32
    %c0_i32_0 = arith.constant 0 : i32
    return %arg0, %c0_i32, %arg1 : i32, i32, i32
  }
  func.func @transform_4(%arg0: i32, %arg1: i32) -> (i32, i32, i32) {
    %c0_i32 = arith.constant 0 : i32
    %c0_i32_0 = arith.constant 0 : i32
    return %arg0, %c0_i32, %arg1 : i32, i32, i32
  }
  func.func @transform_5(%arg0: i32, %arg1: i32) -> (i32, i32, i32) {
    %c0_i32 = arith.constant 0 : i32
    %c0_i32_0 = arith.constant 0 : i32
    return %arg0, %c0_i32, %arg1 : i32, i32, i32
  }
}

</mosaic_0001>

<bundles_post_ra>
// kernel: tpu_custom_call.1
= control target key start
LH: loop header
LB: loop body
LE: loop exit
PB: predicated region body
PF: predicated region fallthrough
CT: control target
= control target key end

     0   :  { %s1559_s0 = inlined_call_operand.hbm [shape: f32[3,8,8], index: 0, kind: input, shape index: {}]   ;;  %s1560_s1 = inlined_call_operand.hbm [shape: f32[2,8,32], index: 1, kind: input, shape index: {}]   ;;  %s1561_s2 = inlined_call_operand.hbm [shape: f32[2,8,32], index: 2, kind: output, shape index: {0}]   ;;  %s1562_s3 = inlined_call_operand.hbm [shape: f32[2,8,32], index: 3, kind: output, shape index: {1}]   ;;  %s1563_s4 = inlined_call_operand.hbm [shape: f32[2,8,32], index: 4, kind: output, shape index: {2}]   ;;  %s1564_s5 = inlined_call_operand.hbm [shape: f32[2,8,32], index: 5, kind: output, shape index: {3}]  }
   0x1   :  { %1570 = sst [smem:[#allocation18_spill]] %s1559_s0 }
   0x2   :  { %1571 = sst [smem:[#allocation19_spill]] %s1560_s1 }
   0x3   :  { %11 = vsyncpa [#allocation3], 0 }
   0x4   :  { %12 = vsyncpa [#allocation6], 0 }
   0x5   :  { %14 = vsyncpa [#allocation6 + $0x1], 0 }
   0x6   :  { %15 = vsyncpa [#allocation4], 0 }
   0x7   :  { %17 = vsyncpa [#allocation4 + $0x1], 0 }
   0x8   :  { %18 = vsyncpa [#allocation9], 0 }
   0x9   :  { %20 = vsyncpa [#allocation9 + $0x1], 0 }
   0xa   :  { %21 = vsyncpa [#allocation12], 0 }
   0xb   :  { %23 = vsyncpa [#allocation12 + $0x1], 0  ;;  %s1221_s18 = smov 0   ;;  %s1223_s19 = smov 0  }
   0xc   :  { %s1225_s20 = smov 0   ;;  %s1227_s21 = smov 0  }
   0xd   :  { %s1229_s22 = smov 0   ;;  %s1231_s23 = smov 0  }
   0xe LB: > { %s1252_s24 = sadd.s32 4294967295, %s1179_s23   ;;  %s1568_s25 = sadd.s32 4294967294, %s1179_s23   ;;  %s1179_s23 = sphi %s1231_s23, %s29_s23   ;;  %s1175_s22 = sphi %s1229_s22, %s1594_s22   ;;  %s1171_s21 = sphi %s1227_s21, %s1593_s21   ;;  %s1167_s20 = sphi %s1225_s20, %s1592_s20   ;;  %s1163_s19 = sphi %s1223_s19, %s1591_s19   ;;  %s1159_s18 = sphi %s1221_s18, %s1590_s18  }
   0xf   : > { %p84_p0 = scmp.ne.s32.totalorder %s1163_s19, %s1159_s18  ;;  %p1565_p1 = scmp.eq.s32.totalorder %s1252_s24, 0 }
  0x10   : > { %p116_p3 = scmp.eq.s32.totalorder %s1568_s25, 1  ;;  %p805_p5 = scmp.ge.s32.totalorder %s1179_s23, 1 }
  0x11   : > { %p1263_p4 = por %p1565_p1, %p84_p0  ;;  %p207_p7 = scmp.lt.s32.totalorder %s1179_s23, 3 }
  0x12   : > { %p1268_p6 = por %p116_p3, %p84_p0  ;;  %s1181_s29 = smov [#allocation2]  }
  0x13   : > { %s1572_s26 = scalar_select %p1263_p4, 1, 0 }
  0x14   : > { %s1573_s27 = scalar_select %p1268_p6, 1, 0 }
  0x15   : > { %p1273_p8 = pnand %p805_p5, %p207_p7  ;;  %s219_s30 = sshll.u32 %s1181_s29, 4  ;;  %s220_s30 = int_to_ptr.vmem [resolvable:$true] %s219_s30 }
  0x16   : > { %s41_s7 = sadd.s32 1, %s1175_s22  ;;  %s1576_s0 = sld [smem:[#allocation18_spill]] }
  0x17   : > { %s1574_s28 = scalar_select %p1273_p8, 1, 0 }
  0x18   : > { %p865_p9 = pneg %p1273_p8 }
  0x1a   : > { %p1282_p11 = pnand %p865_p9, %p1565_p1 }
  0x1c   : > { %s943_s10 = scalar_lea.hbm %s1576_s0, 384  ;;  %p945_p13 = pneg %p1282_p11 }
  0x1d   : > { %p944_p12 = scmp.ne.s32.totalorder %s1576_s0, %s943_s10  ;;  %p950_p5 = scmp.lt.u32.totalorder %s943_s10, %s1576_s0 }
  0x1f   : > { %p946_p0 = pnand %p945_p13, %p944_p12 }
  0x21   : > { %p947_p3 = pneg %p946_p0 }
  0x23   : > { %p952_p7 = pnand %p950_p5, %p947_p3 }
  0x25   : > { %955 = shalt.err (!%p952_p7)
}
  0x26   : > { %s956_s15 = scalar_lea.vmem %s220_s30, 384  ;;  %p964_p2 = scmp.lt.s32.totalorder %s220_s30, %s220_s30 }
  0x27   : > { %p957_p9 = scmp.ne.s32.totalorder %s220_s30, %s956_s15  ;;  %p965_p6 = scmp.lt.s32.totalorder %s956_s15, %s956_s15 }
  0x29   : > { %p959_p10 = pnand %p957_p9, %p945_p13  ;;  %p966_p4 = por %p965_p6, %p964_p2 }
  0x2b   : > { %p960_p1 = pneg %p959_p10 }
  0x2d   : > { %p967_p8 = pnand %p966_p4, %p960_p1 }
  0x2f   : > { %970 = shalt.err (!%p967_p8)
}
  0x30   : > { %s1182_s16 = smov 128   ;;  %s1183_s17 = smov 8  }
  0x31   : > { %868 = dma.hbm_to_vmem [thread:$0]  (!%p1282_p11), %s1576_s0, 384, %s220_s30, [#allocation3], %s1182_s16, %s1182_s16, %s1183_s17  }
  0x32   : > { %p43_p1 = scmp.ge.s32.totalorder %s41_s7, 2  ;;  %s71_s9 = sadd.s32 1, %s1167_s20 }
  0x33   : > { %p78_p2 = scmp.ne.s32.totalorder %s1167_s20, %s1163_s19  ;;  %p79_p4 = scmp.eq.s32.totalorder %s1179_s23, 0 }
  0x34   : > { %s1596_s7 = smov (%p43_p1, %s41_s7), 0  ;;  %p1578_p8 = scmp.eq.s32.totalorder %s1252_s24, 1 }
  0x35   : > { %p1309_p6 = por %p79_p4, %p78_p2  ;;  %s66_s6 = ssub.s32 %s1175_s22, %s1596_s7 }
  0x36   : > { %p1315_p10 = por %p1578_p8, %p78_p2  ;;  %p887_p12 = scmp.lt.s32.totalorder %s1179_s23, 2 }
  0x37   : > { %p69_p11 = scmp.eq.s32.totalorder %s66_s6, 0  ;;  %s233_s30 = sand.u32 1, %s1167_s20  }
  0x38   : > { %s808_s12 = sshll.u32 %s233_s30, 3  ;;  %s809_s14 = sshll.u32 %s1175_s22, 7 }
  0x39   : > { %s1324_s13 = scalar_select %p69_p11, %s1167_s20, %s71_s9  }
  0x3a   : > { %s1580_s1 = sld [smem:[#allocation19_spill]]  ;;  %s237_s29 = scalar_lea.vmem [#allocation5], %s808_s12 }
  0x3b   : > { %s245_s8 = sshll.u32 %s237_s29, 4  ;;  %p1336_p13 = pnand %p887_p12, %p1309_p6  ;;  %s1332_s8 = int_to_ptr.vmem [resolvable:$true] %s245_s8 }
  0x3c   : > { %s234_s9 = scalar_lea.sflag [#allocation6], %s233_s30 }
  0x3d   : > { %p973_p3 = pneg %p1336_p13 }
  0x40   : > { %s1330_s17 = scalar_lea.hbm %s1580_s1, %s809_s14  ;;  %s976_s15 = scalar_lea.hbm %s1580_s1, 256 }
  0x41   : > { %s971_s25 = scalar_lea.hbm %s1330_s17, 128  ;;  %p977_p9 = scmp.lt.u32.totalorder %s1330_s17, %s1580_s1 }
  0x42   : > { %p972_p0 = scmp.ne.s32.totalorder %s1330_s17, %s971_s25  ;;  %p978_p1 = scmp.lt.u32.totalorder %s976_s15, %s971_s25 }
  0x43   : > { %p980_p4 = scmp.lt.u32.totalorder %s971_s25, %s1330_s17 }
  0x44   : > { %p974_p5 = pnand %p973_p3, %p972_p0  ;;  %p979_p2 = por %p978_p1, %p977_p9 }
  0x46   : > { %p975_p7 = pneg %p974_p5  ;;  %p981_p6 = por %p980_p4, %p979_p2 }
  0x48   : > { %p982_p8 = pnand %p981_p6, %p975_p7 }
  0x4a   : > { %985 = shalt.err (!%p982_p8)
}
  0x4b   : > { %s986_s30 = scalar_lea.vmem %s1332_s8, 128  ;;  %s1184_s29 = smov [#allocation5]  }
  0x4c   : > { %p987_p12 = scmp.ne.s32.totalorder %s1332_s8, %s986_s30  ;;  %s991_s12 = sshll.u32 %s1184_s29, 4  ;;  %s992_s12 = int_to_ptr.vmem [resolvable:$false] %s991_s12 }
  0x4d   : > { %s993_s14 = scalar_lea.vmem %s992_s12, 256  ;;  %p994_p5 = scmp.lt.s32.totalorder %s1332_s8, %s992_s12 }
  0x4e   : > { %p989_p11 = pnand %p987_p12, %p973_p3  ;;  %p995_p9 = scmp.lt.s32.totalorder %s993_s14, %s986_s30 }
  0x50   : > { %p990_p0 = pneg %p989_p11  ;;  %p996_p1 = por %p995_p9, %p994_p5 }
  0x52   : > { %p997_p2 = pnand %p996_p1, %p990_p0 }
  0x54   : > { %1000 = shalt.err (!%p997_p2)
}
  0x55   : > { %872 = dma.hbm_to_vmem [thread:$0]  (!%p1336_p13), %s1330_s17, 128, %s1332_s8, %s234_s9  }
  0x56   : > { %p1582_p7 = scmp.ne.s32.totalorder %s1574_s28, 0 }
  0x57   : > { %p1583_p3 = scmp.eq.s32.totalorder (!%p1582_p7), %s1252_s24, 0 }
  0x58   : > { %254 = sbr.rel (%p1582_p7) target bundleno = 407 (0x197), region = 28 }
  0x5f   : > { %1138 = dma.done.wait (%p1583_p3), [#allocation3], 384   ;;  %p1584_p4 = pmov %p1583_p3 }
  0x60   : > { %s1372_s25 = sand.u32 1, %s1163_s19   ;;  %p1585_p13 = scmp.ne.s32.totalorder %s1572_s26, 0 }
  0x61   : > { %1140 = vsyncadd (%p1584_p4), [#allocation3], 4294966912  ;;  %s1375_s15 = sshll.u32 %s1372_s25, 3  ;;  %s261_s6 = scalar_lea.sflag [#allocation6], %s1372_s25 }
  0x62   : > { %s264_s17 = scalar_lea.vmem [#allocation5], %s1375_s15 }
  0x63   : > { %1142 = dma.done.wait (%p1585_p13), %s261_s6, 128  }
  0x64   : > { %1144 = vsyncadd (%p1585_p13), %s261_s6, 4294967168  ;;  %v1185_v0 = vmov 0.0   ;;  %vm1186_vm0 = vmmov 0   ;;  %vm308_vm1 = vcmask 64512   ;;  %v1383_v1 = vld [vmem:[%s264_s17] sm:$0xff]  ;;  %v386_v3 = vld [vmem:[#allocation2 + $0x8] sm:$0xff] }
  0x65   : > { %836 = vmatprep.subr.mxu0 %v1185_v0  ;;  %838 = vmatprep.mubr.msk.f32.mxu0 %vm1186_vm0, %v1185_v0  ;;  %v307_v2 = vld [vmem:[#allocation2] sm:$0xff]  ;;  %v463_v4 = vld [vmem:[#allocation2 + $0x10] sm:$0xff]  ;;  %s548_s26 = sand.u32 1, %s1252_s24   ;;  %s1390_s28 = sshll.u32 %s1171_s21, 7  ;;  %vm382_vm2 = vcmask 261120  }
  0x66   : > { %841 = vmatprep.subr.mxu1 %v1185_v0  ;;  %843 = vmatprep.mubr.msk.f32.mxu1 %vm1186_vm0, %v1185_v0  ;;  %s298_s8 = scalar_lea.vmem [#allocation10], %s1375_s15  ;;  %s291_s10 = scalar_lea.vmem [#allocation8], %s1375_s15 }
  0x67   : > { %837 = vmatpush3.msra.mxu0 %v1383_v1  ;;  %842 = vmatpush3.msra.mxu1 %v1383_v1  ;;  %s601_s9 = sshll.u32 %s298_s8, 4  ;;  %s587_s16 = sshll.u32 %s291_s10, 4  ;;  %s1403_s16 = int_to_ptr.vmem [resolvable:$true] %s587_s16  ;;  %s1411_s9 = int_to_ptr.vmem [resolvable:$true] %s601_s9 }
  0x68   : > { %839 = vmatmul.mubr.msk.f32.vlgmr.msra.gmra.mrb[0].mxu0 %vm308_vm1, %v307_v2  ;;  %846 = vmatprep.subr.mxu0 %v1185_v0  ;;  %s1398_s12 = scalar_lea.hbm %s1562_s3, %s1390_s28  ;;  %s1569_s14 = scalar_lea.vmem [#allocation11], %s1375_s15 }
  0x69   : > { %844 = vmatmul.mubr.msk.f32.vlgmr.msra.gmra.mrb[0].mxu1 %vm308_vm1, %v386_v3  ;;  %847 = vmatpush3.msra.mxu0 %v1383_v1  ;;  %s615_s6 = sshll.u32 %s1569_s14, 4  ;;  %s1409_s17 = scalar_lea.hbm %s1563_s4, %s1390_s28  ;;  %s1420_s6 = int_to_ptr.vmem [resolvable:$true] %s615_s6 }
  0x6a   : > { %848 = vmatprep.mubr.msk.f32.mxu0 %vm1186_vm0, %v1185_v0  ;;  %s1418_s14 = scalar_lea.hbm %s1564_s5, %s1390_s28  ;;  %s1423_s21 = scalar_lea.sflag [#allocation9], %s548_s26 }
  0x6b   : > { %s1001_s24 = scalar_lea.vmem %s1403_s16, 128 }
  0x6c   : > { %849 = vmatmul.mubr.msk.f32.vlgmr.msra.gmra.mrb[2].mxu0 %vm308_vm1, %v463_v4  ;;  %p1002_p6 = scmp.ne.s32.totalorder %s1403_s16, %s1001_s24 }
  0x6e   : > { %p1003_p8 = pnand %p1002_p6, %p1315_p10 }
  0x70   : > { %p1004_p12 = pneg %p1003_p8 }
 0x13b   : > { %v378_v5 = vpop.f32.mrb[0].mxu0 }
 0x13c   : > { %383 = vst.msk [vmem:[%s291_s10] sm:$0xff] %vm382_vm2, %v378_v5  ;;  %v840_v6 = vpop.f32.mrb[1].mxu0  ;;  %v456_v7 = vpop.f32.mrb[0].mxu1  ;;  %s1187_s10 = smov [#allocation8]  }
 0x13d   : > { %460 = vst.msk [vmem:[%s298_s8] sm:$0xff] %vm382_vm2, %v456_v7  ;;  %v461_v8 = vadd.f32 %v456_v7, %v378_v5  ;;  %v845_v9 = vpop.f32.mrb[1].mxu1  ;;  %s1005_s0 = sshll.u32 %s1187_s10, 4  ;;  %s1006_s0 = int_to_ptr.vmem [resolvable:$false] %s1005_s0 }
 0x13e   : > { %s1007_s1 = scalar_lea.vmem %s1006_s0, 256  ;;  %p1008_p11 = scmp.lt.s32.totalorder %s1403_s16, %s1006_s0 }
 0x13f   : > { %p1009_p0 = scmp.lt.s32.totalorder %s1007_s1, %s1001_s24 }
 0x141   : > { %p1010_p5 = por %p1009_p0, %p1008_p11 }
 0x143   : > { %p1011_p9 = pnand %p1010_p5, %p1004_p12 }
 0x145   : > { %1014 = shalt.err (!%p1011_p9)
}
 0x146   : > { %s1015_s26 = scalar_lea.hbm %s1398_s12, 128  ;;  %s1019_s29 = scalar_lea.hbm %s1562_s3, 256 }
 0x147   : > { %p1016_p1 = scmp.ne.s32.totalorder %s1398_s12, %s1015_s26  ;;  %p1020_p3 = scmp.lt.u32.totalorder %s1398_s12, %s1562_s3 }
 0x148   : > { %p1021_p4 = scmp.lt.u32.totalorder %s1019_s29, %s1015_s26  ;;  %p1023_p6 = scmp.lt.u32.totalorder %s1015_s26, %s1398_s12 }
 0x149   : > { %p1017_p2 = pnand %p1016_p1, %p1315_p10 }
 0x14a   : > { %p1022_p13 = por %p1021_p4, %p1020_p3 }
 0x14b   : > { %p1018_p7 = pneg %p1017_p2 }
 0x14c   : > { %p1024_p8 = por %p1023_p6, %p1022_p13 }
 0x14e   : > { %p1025_p12 = pnand %p1024_p8, %p1018_p7 }
 0x150   : > { %1028 = shalt.err (!%p1025_p12)
}
 0x151   : > { %858 = dma.vmem_to_hbm [thread:$0]  (%p1315_p10), %s1403_s16, 128, %s1398_s12, %s1423_s21  }
 0x152   : > { %s1029_s1 = scalar_lea.vmem %s1411_s9, 128  ;;  %s1188_s24 = smov [#allocation10]  }
 0x153   : > { %p1030_p11 = scmp.ne.s32.totalorder %s1411_s9, %s1029_s1  ;;  %s1033_s26 = sshll.u32 %s1188_s24, 4  ;;  %s1034_s26 = int_to_ptr.vmem [resolvable:$false] %s1033_s26 }
 0x154   : > { %s1035_s8 = scalar_lea.vmem %s1034_s26, 256  ;;  %p1036_p9 = scmp.lt.s32.totalorder %s1411_s9, %s1034_s26 }
 0x155   : > { %p1031_p0 = pnand %p1030_p11, %p1315_p10  ;;  %p1037_p1 = scmp.lt.s32.totalorder %s1035_s8, %s1029_s1 }
 0x157   : > { %p1032_p5 = pneg %p1031_p0  ;;  %p1038_p2 = por %p1037_p1, %p1036_p9 }
 0x159   : > { %p1039_p7 = pnand %p1038_p2, %p1032_p5 }
 0x15b   : > { %1042 = shalt.err (!%p1039_p7)
}
 0x15c   : > { %s1043_s16 = scalar_lea.hbm %s1409_s17, 128  ;;  %s1047_s29 = scalar_lea.hbm %s1563_s4, 256 }
 0x15d   : > { %p1044_p3 = scmp.ne.s32.totalorder %s1409_s17, %s1043_s16  ;;  %p1048_p6 = scmp.lt.u32.totalorder %s1409_s17, %s1563_s4 }
 0x15e   : > { %p1049_p8 = scmp.lt.u32.totalorder %s1047_s29, %s1043_s16  ;;  %p1051_p11 = scmp.lt.u32.totalorder %s1043_s16, %s1409_s17 }
 0x15f   : > { %p1045_p4 = pnand %p1044_p3, %p1315_p10 }
 0x160   : > { %p1050_p12 = por %p1049_p8, %p1048_p6 }
 0x161   : > { %p1046_p13 = pneg %p1045_p4 }
 0x162   : > { %p1052_p0 = por %p1051_p11, %p1050_p12 }
 0x164   : > { %p1053_p5 = pnand %p1052_p0, %p1046_p13 }
 0x166   : > { %1056 = shalt.err (!%p1053_p5)
}
 0x167   : > { %859 = dma.vmem_to_hbm [thread:$0]  (%p1315_p10), %s1411_s9, 128, %s1409_s17, %s1423_s21   ;;  %v533_v10 = vpop.f32.mrb[2].mxu0  ;;  %v539_v12 = vmul.f32 1.5, %v1383_v1 }
 0x168   : > { %s1586_s1 = scalar_lea.vmem [#allocation11], %s1375_s15  ;;  %v538_v11 = vadd.f32 %v533_v10, %v461_v8  ;;  %v850_v13 = vpop.f32.mrb[3].mxu0  ;;  %s284_s24 = scalar_lea.vmem [#allocation7], %s1375_s15 }
 0x169   : > { %537 = vst.msk [vmem:[%s1586_s1] sm:$0xff] %vm382_vm2, %v533_v10  ;;  %s1476_s26 = sshll.u32 %s284_s24, 4  ;;  %s559_s8 = scalar_lea.sflag [#allocation12], %s1372_s25  ;;  %s1507_s26 = int_to_ptr.vmem [resolvable:$true] %s1476_s26 }
 0x16a   : > { %s1057_s16 = scalar_lea.vmem %s1420_s6, 128  ;;  %s1189_s9 = smov [#allocation11]  }
 0x16b   : > { %p1058_p9 = scmp.ne.s32.totalorder %s1420_s6, %s1057_s16  ;;  %s1061_s17 = sshll.u32 %s1189_s9, 4  ;;  %s1062_s17 = int_to_ptr.vmem [resolvable:$false] %s1061_s17 }
 0x16c   : > { %s1063_s21 = scalar_lea.vmem %s1062_s17, 256  ;;  %p1064_p7 = scmp.lt.s32.totalorder %s1420_s6, %s1062_s17 }
 0x16d   : > { %p1059_p1 = pnand %p1058_p9, %p1315_p10  ;;  %p1065_p3 = scmp.lt.s32.totalorder %s1063_s21, %s1057_s16 }
 0x16f   : > { %p1060_p2 = pneg %p1059_p1  ;;  %p1066_p4 = por %p1065_p3, %p1064_p7 }
 0x171   : > { %p1067_p13 = pnand %p1066_p4, %p1060_p2 }
 0x173   : > { %1070 = shalt.err (!%p1067_p13)
}
 0x174   : > { %s1071_s12 = scalar_lea.hbm %s1418_s14, 128  ;;  %s1075_s10 = scalar_lea.hbm %s1564_s5, 256 }
 0x175   : > { %p1072_p6 = scmp.ne.s32.totalorder %s1418_s14, %s1071_s12  ;;  %p1076_p11 = scmp.lt.u32.totalorder %s1418_s14, %s1564_s5 }
 0x176   : > { %p1077_p0 = scmp.lt.u32.totalorder %s1075_s10, %s1071_s12  ;;  %p1079_p9 = scmp.lt.u32.totalorder %s1071_s12, %s1418_s14 }
 0x177   : > { %p1073_p8 = pnand %p1072_p6, %p1315_p10 }
 0x178   : > { %p1078_p5 = por %p1077_p0, %p1076_p11 }
 0x179   : > { %p1074_p12 = pneg %p1073_p8 }
 0x17a   : > { %p1080_p1 = por %p1079_p9, %p1078_p5 }
 0x17c   : > { %p1081_p2 = pnand %p1080_p1, %p1074_p12 }
 0x17e   : > { %1084 = shalt.err (!%p1081_p2)
}
 0x17f   : > { %860 = dma.vmem_to_hbm [thread:$0]  (%p1315_p10), %s1420_s6, 128, %s1418_s14, %s559_s8   ;;  %v540_v14 = vmul.f32 0.5, %v538_v11 }
 0x180   : > { %s1504_s17 = scalar_lea.hbm %s1561_s2, %s1390_s28  ;;  %s544_s21 = scalar_lea.sflag [#allocation4], %s1372_s25 }
 0x181   : > { %v541_v15 = vsub.f32 %v539_v12, %v540_v14  ;;  %s1085_s12 = scalar_lea.vmem %s1507_s26, 128  ;;  %s1190_s14 = smov [#allocation7]  }
 0x182   : > { %p1086_p7 = scmp.ne.s32.totalorder %s1507_s26, %s1085_s12  ;;  %s1089_s6 = sshll.u32 %s1190_s14, 4  ;;  %s1090_s6 = int_to_ptr.vmem [resolvable:$false] %s1089_s6 }
 0x183   : > { %542 = vst.msk [vmem:[%s284_s24] sm:$0xff] %vm382_vm2, %v541_v15  ;;  %s1091_s8 = scalar_lea.vmem %s1090_s6, 256  ;;  %p1092_p13 = scmp.lt.s32.totalorder %s1507_s26, %s1090_s6 }
 0x184   : > { %p1087_p3 = pnand %p1086_p7, %p1315_p10  ;;  %p1093_p6 = scmp.lt.s32.totalorder %s1091_s8, %s1085_s12 }
 0x186   : > { %p1088_p4 = pneg %p1087_p3  ;;  %p1094_p8 = por %p1093_p6, %p1092_p13 }
 0x188   : > { %p1095_p12 = pnand %p1094_p8, %p1088_p4 }
 0x18a   : > { %1098 = shalt.err (!%p1095_p12)
}
 0x18b   : > { %s1099_s25 = scalar_lea.hbm %s1504_s17, 128  ;;  %s1103_s24 = scalar_lea.hbm %s1561_s2, 256 }
 0x18c   : > { %p1100_p11 = scmp.ne.s32.totalorder %s1504_s17, %s1099_s25  ;;  %p1104_p9 = scmp.lt.u32.totalorder %s1504_s17, %s1561_s2 }
 0x18d   : > { %p1105_p1 = scmp.lt.u32.totalorder %s1103_s24, %s1099_s25  ;;  %p1107_p7 = scmp.lt.u32.totalorder %s1099_s25, %s1504_s17 }
 0x18e   : > { %p1101_p0 = pnand %p1100_p11, %p1315_p10 }
 0x18f   : > { %p1106_p2 = por %p1105_p1, %p1104_p9 }
 0x190   : > { %p1102_p5 = pneg %p1101_p0 }
 0x191   : > { %p1108_p3 = por %p1107_p7, %p1106_p2 }
 0x193   : > { %p1109_p4 = pnand %p1108_p3, %p1102_p5 }
 0x195   : > { %1112 = shalt.err (!%p1109_p4)
}
 0x196   : > { %857 = dma.vmem_to_hbm [thread:$0]  (%p1315_p10), %s1507_s26, 128, %s1504_s17, %s544_s21  }
 0x197 PF: > { %s627_s10 = sand.u32 1, %s1159_s18   ;;  %p1587_p13 = scmp.ne.s32.totalorder %s1573_s27, 0 }
 0x198   : > { %p1588_p6 = scmp.ge.s32.totalorder %s1179_s23, 2  ;;  %s628_s0 = scalar_lea.sflag [#allocation4], %s627_s10 }
 0x19a   : > { %p874_p8 = pnand %p1588_p6, %p1587_p13 }
 0x19c   : > { %1146 = dma.done.wait (!%p874_p8), %s628_s0, 128  }
 0x19d   : > { %1148 = vsyncadd (!%p874_p8), %s628_s0, 4294967168  ;;  %s1589_s1 = sadd.s32 4294967294, %s1179_s23  }
 0x19e   : > { %s636_s16 = sand.u32 1, %s1589_s1  }
 0x19f   : > { %s637_s9 = scalar_lea.sflag [#allocation9], %s636_s16 }
 0x1a0   : > { %1150 = dma.done.wait (!%p874_p8), %s637_s9, 256  }
 0x1a1   : > { %1152 = vsyncadd (!%p874_p8), %s637_s9, 4294967040  ;;  %s655_s11 = scalar_lea.sflag [#allocation12], %s627_s10 }
 0x1a2   : > { %1154 = dma.done.wait (!%p874_p8), %s655_s11, 128  }
 0x1a3   : > { %1156 = vsyncadd (!%p874_p8), %s655_s11, 4294967168  ;;  %s29_s23 = sadd.s32 1, %s1179_s23   ;;  %s1590_s18 = smov %s1163_s19 }
 0x1a4   : > { %p26_p10 = scmp.ge.s32.totalorder %s29_s23, 4   ;;  %s1591_s19 = smov %s1167_s20 }
 0x1a5   : > { %s1592_s20 = smov %s1324_s13  ;;  %s1593_s21 = smov %s1175_s22 }
 0x1a6   : > { %s1594_s22 = smov %s1596_s7  ;;  %28 = sbr.rel (!%p26_p10) target bundleno = 14 (0xe), region = 129 }
 0x1ad   :  { %660 = vsyncpa [#allocation3], 1 }
 0x1ae   :  { %662 = vsyncpa [#allocation3 + $0x1], 1 }
 0x1af   :  { %663 = vsyncpa [#allocation6], 1 }
 0x1b0   :  { %665 = vsyncpa [#allocation6 + $0x1], 1 }
 0x1b1   :  { %666 = vsyncpa [#allocation4], 1 }
 0x1b2   :  { %668 = vsyncpa [#allocation4 + $0x1], 1 }
 0x1b3   :  { %669 = vsyncpa [#allocation9], 1 }
 0x1b4   :  { %671 = vsyncpa [#allocation9 + $0x1], 1 }
 0x1b5   :  { %672 = vsyncpa [#allocation12], 1 }
 0x1b6   :  { %674 = vsyncpa [#allocation12 + $0x1], 1 }

</bundles_post_ra>
